<compile_context>
chip_gen: v7x
topology: tpu7x:2x2x1
jax: 0.10.0
libtpu: 0.0.40
codegen_flags: <defaults>
</compile_context>

<pallas_src>
import functools

import jax
import jax.numpy as jnp
from jax import lax
from jax.experimental import pallas as pl
from jax.experimental.pallas import tpu as pltpu

# Sobel filters (F.conv2d is cross-correlation, so taps are used as-is).
SOBEL_X = ((-1.0, 0.0, 1.0), (-2.0, 0.0, 2.0), (-1.0, 0.0, 1.0))
SOBEL_Y = ((-1.0, -2.0, -1.0), (0.0, 0.0, 0.0), (1.0, 2.0, 1.0))


def _round_up(v, m):
    return (v + m - 1) // m * m


def _vmem_capacity_bytes():
    try:
        return int(pltpu.get_tpu_info().vmem_capacity_bytes)
    except Exception:
        return 64 * 1024 * 1024  # conservative per-core fallback (v7x-sized)


def _edge_kernel(x_ref, o_ref, mpad_ref, apad_ref, bpad_ref, *, C, W, HW, PAD):
    # x_ref: (nb, C*HW) block, o_ref: (nb, HW), *_pad_ref: (nb, HW + 2*PAD) f32
    nb = x_ref.shape[0]

    # ---- channel mean (f32 accumulation); channels are lane-contiguous slices.
    acc = x_ref[:, 0:HW].astype(jnp.float32)
    for c in range(1, C):
        acc = acc + x_ref[:, c * HW:(c + 1) * HW].astype(jnp.float32)
    # TODO(synk): for very large C, add a C grid axis with a pl.when-gated
    # accumulator instead of this unrolled loop / single huge input block.
    m = acc * (1.0 / C)                                    # (nb, HW)

    # Column-boundary masks, computed once at (1, HW) and broadcast over rows.
    col = lax.broadcasted_iota(jnp.int32, (1, HW), 1) % W
    has_left = col != 0            # a (j-1) neighbour exists
    has_right = col != (W - 1)     # a (j+1) neighbour exists

    def store_padded(pad_ref, val):
        # Zero-bordered slab: the zeros are exactly the conv's zero padding.
        z = jnp.zeros((nb, PAD), jnp.float32)
        pad_ref[:, 0:PAD] = z                              # left border (aligned)
        pad_ref[:, PAD + HW:PAD + HW + PAD] = z            # right border
        pad_ref[:, PAD:PAD + HW] = val                     # lane-aligned value

    def shifted(pad_ref, off):
        # value[f + off] with zeros outside [0, HW): one shifted VMEM read,
        # no slice+concat copy materialised.
        return pad_ref[:, PAD + off:PAD + off + HW]

    # ---- horizontal pass on m: [1,2,1] smooth and [-1,0,1] derivative -------
    store_padded(mpad_ref, m)
    m_l = jnp.where(has_left, shifted(mpad_ref, -1), 0.0)   # m[i, j-1]
    m_r = jnp.where(has_right, shifted(mpad_ref, +1), 0.0)  # m[i, j+1]
    a = m_l + 2.0 * m + m_r        # feeds sobel_y rows
    b = m_r - m_l                  # feeds sobel_x rows

    # ---- vertical pass: +-W shifts stay in the same column -> no masks ------
    store_padded(apad_ref, a)
    store_padded(bpad_ref, b)
    ex = shifted(bpad_ref, -W) + 2.0 * b + shifted(bpad_ref, +W)  # conv(m, sobel_x)
    ey = shifted(apad_ref, +W) - shifted(apad_ref, -W)            # conv(m, sobel_y)

    o_ref[...] = jnp.sqrt(ex * ex + ey * ey).astype(o_ref.dtype)


def edge_detection(x, *, target_block_bytes=None):
    """x: (N, C, H, W) float (f32 or bf16) -> (N, 1, H, W) float32 edge magnitude."""
    N, C, H, W = x.shape
    HW = H * W
    PAD = _round_up(max(W, 1), 128)        # lane-aligned zero border for the scratch

    # Free row-major view: batch on sublanes, channels*space dense on lanes.
    xf = x.reshape(N, C * HW)

    # Explicit VMEM budget: ~3/4 of the chip's capacity (v5e/v6e ~96 MiB,
    # v7x ~48 MiB), with the per-step input block at ~1/8 of that budget.
    vmem_limit = int(min(_vmem_capacity_bytes() * 3 // 4, 128 * 1024 * 1024))
    if target_block_bytes is None:
        target_block_bytes = int(max(1 << 20, min(vmem_limit // 8, 16 << 20)))

    bytes_per_image = C * HW * x.dtype.itemsize
    nb = int(max(1, min(N, target_block_bytes // max(bytes_per_image, 1))))
    if N >= 16:
        nb = min(nb, N // 2)       # >= 2 grid steps so "parallel" spans both v7x TCs
    if nb >= 8:
        nb -= nb % 8               # sublane-dense, (8,128)-conforming blocks
    elif N <= 8:
        nb = N                     # tiny batch: one block covering the full batch dim
    else:
        nb = 8
        while nb > 1 and nb * bytes_per_image > 2 * target_block_bytes:
            nb -= 1                # huge images: shrink below 8 rather than blow VMEM
        # TODO(synk): for a single image larger than the VMEM budget, also tile
        # over H (with a 1-row halo) inside the grid.
    grid = pl.cdiv(N, nb)          # padded last block; no exact-divisor search

    kernel = functools.partial(_edge_kernel, C=C, W=W, HW=HW, PAD=PAD)
    out_flat = pl.pallas_call(
        kernel,
        out_shape=jax.ShapeDtypeStruct((N, HW), jnp.float32),
        grid_spec=pltpu.PrefetchScalarGridSpec(
            num_scalar_prefetch=0,
            grid=(grid,),
            in_specs=[pl.BlockSpec((nb, C * HW), lambda n: (n, 0))],
            out_specs=pl.BlockSpec((nb, HW), lambda n: (n, 0)),
            scratch_shapes=[pltpu.VMEM((nb, HW + 2 * PAD), jnp.float32)] * 3,
        ),
        compiler_params=pltpu.CompilerParams(
            dimension_semantics=("parallel",),
            vmem_limit_bytes=vmem_limit),
    )(xf)
    return out_flat.reshape(N, 1, H, W)


def _edge_detection_ref(x):
    """Plain-JAX reference (matches F.conv2d cross-correlation, padding=1)."""
    m = jnp.mean(x, axis=1, keepdims=True)
    kx = jnp.asarray(SOBEL_X, jnp.float32)[None, None]
    ky = jnp.asarray(SOBEL_Y, jnp.float32)[None, None]
    dn = lax.conv_dimension_numbers(m.shape, kx.shape, ("NCHW", "OIHW", "NCHW"))
    ex = lax.conv_general_dilated(m, kx, (1, 1), ((1, 1), (1, 1)),
                                  dimension_numbers=dn)
    ey = lax.conv_general_dilated(m, ky, (1, 1), ((1, 1), (1, 1)),
                                  dimension_numbers=dn)
    return jnp.sqrt(ex ** 2 + ey ** 2)


if __name__ == "__main__":
    key = jax.random.PRNGKey(0)
    N, C, H, W = 2, 4, 16, 16
    x = jax.random.normal(key, (N, C, H, W), dtype=jnp.float32)

    out = jax.block_until_ready(edge_detection(x))
    ref = jax.block_until_ready(_edge_detection_ref(x))

    assert out.shape == (N, 1, H, W)
    assert jnp.allclose(out, ref, atol=1e-4, rtol=1e-4), "mismatch vs reference"

    print("KERNEL_OK")
</pallas_src>

<mosaic_0001>
module attributes {stable_mosaic.version = 11 : i64} {
  func.func @_edge_kernel(%arg0: i32, %arg1: memref<2x1024xf32, #tpu.memory_space<vmem>>, %arg2: memref<2x256xf32, #tpu.memory_space<vmem>>, %arg3: memref<2x512xf32, #tpu.memory_space<vmem>>, %arg4: memref<2x512xf32, #tpu.memory_space<vmem>>, %arg5: memref<2x512xf32, #tpu.memory_space<vmem>>) attributes {dimension_semantics = [#tpu.dimension_semantics<parallel>], iteration_bounds = array<i64: 1>, scalar_prefetch = 0 : i64, scratch_operands = 3 : i64, tpu.core_type = #tpu.core_type<tc>, window_params = [{transform_indices = @transform_0, window_bounds = array<i64: 2, 1024>}, {transform_indices = @transform_1, window_bounds = array<i64: 2, 256>}]} {
    %c0 = arith.constant 0 : index
    %c0_0 = arith.constant 0 : index
    %0 = vector.load %arg1[%c0, %c0_0] : memref<2x1024xf32, #tpu.memory_space<vmem>>, vector<2x256xf32>
    %c0_1 = arith.constant 0 : index
    %c256 = arith.constant 256 : index
    %1 = vector.load %arg1[%c0_1, %c256] : memref<2x1024xf32, #tpu.memory_space<vmem>>, vector<2x256xf32>
    %2 = arith.addf %0, %1 : vector<2x256xf32>
    %c0_2 = arith.constant 0 : index
    %c512 = arith.constant 512 : index
    %3 = vector.load %arg1[%c0_2, %c512] : memref<2x1024xf32, #tpu.memory_space<vmem>>, vector<2x256xf32>
    %4 = arith.addf %2, %3 : vector<2x256xf32>
    %c0_3 = arith.constant 0 : index
    %c768 = arith.constant 768 : index
    %5 = vector.load %arg1[%c0_3, %c768] : memref<2x1024xf32, #tpu.memory_space<vmem>>, vector<2x256xf32>
    %6 = arith.addf %4, %5 : vector<2x256xf32>
    %cst = arith.constant 2.500000e-01 : f32
    %7 = vector.broadcast %cst : f32 to vector<2x256xf32>
    %8 = arith.mulf %6, %7 : vector<2x256xf32>
    %9 = tpu.iota {dimensions = array<i32: 1>} : vector<1x256xi32>
    %c16_i32 = arith.constant 16 : i32
    %c0_i32 = arith.constant 0 : i32
    %10 = arith.cmpi eq, %c16_i32, %c0_i32 : i32
    %c1_i32 = arith.constant 1 : i32
    %11 = arith.select %10, %c1_i32, %c16_i32 : i32
    %12 = vector.broadcast %11 : i32 to vector<1x256xi32>
    %13 = arith.remsi %9, %12 : vector<1x256xi32>
    %c0_i32_4 = arith.constant 0 : i32
    %14 = vector.broadcast %c0_i32_4 : i32 to vector<1x256xi32>
    %15 = arith.cmpi ne, %13, %14 : vector<1x256xi32>
    %c0_i32_5 = arith.constant 0 : i32
    %16 = vector.broadcast %c0_i32_5 : i32 to vector<1x256xi32>
    %17 = arith.cmpi slt, %13, %16 : vector<1x256xi32>
    %c0_i32_6 = arith.constant 0 : i32
    %18 = arith.cmpi slt, %11, %c0_i32_6 : i32
    %19 = vector.broadcast %18 : i1 to vector<1x256xi1>
    %20 = vector.broadcast %19 : vector<1x256xi1> to vector<1x256xi1>
    %21 = arith.xori %17, %20 : vector<1x256xi1>
    %22 = arith.andi %21, %15 : vector<1x256xi1>
    %23 = vector.broadcast %11 : i32 to vector<1x256xi32>
    %24 = arith.addi %13, %23 : vector<1x256xi32>
    %25 = arith.select %22, %24, %13 : vector<1x256xi1>, vector<1x256xi32>
    %c0_i32_7 = arith.constant 0 : i32
    %26 = vector.broadcast %c0_i32_7 : i32 to vector<1x256xi32>
    %27 = arith.cmpi ne, %25, %26 : vector<1x256xi32>
    %c15_i32 = arith.constant 15 : i32
    %28 = vector.broadcast %c15_i32 : i32 to vector<1x256xi32>
    %29 = arith.cmpi ne, %25, %28 : vector<1x256xi32>
    %cst_8 = arith.constant 0.000000e+00 : f32
    %30 = vector.broadcast %cst_8 : f32 to vector<2x128xf32>
    %c0_9 = arith.constant 0 : index
    %c0_10 = arith.constant 0 : index
    %31 = vector.load %arg3[%c0_9, %c0_10] : memref<2x512xf32, #tpu.memory_space<vmem>>, vector<2x128xf32>
    tpu.vector_store %arg3[%c0_9, %c0_10], %30 {strides = array<i32>} : memref<2x512xf32, #tpu.memory_space<vmem>>, vector<2x128xf32>,
    %c0_11 = arith.constant 0 : index
    %c384 = arith.constant 384 : index
    %32 = vector.load %arg3[%c0_11, %c384] : memref<2x512xf32, #tpu.memory_space<vmem>>, vector<2x128xf32>
    tpu.vector_store %arg3[%c0_11, %c384], %30 {strides = array<i32>} : memref<2x512xf32, #tpu.memory_space<vmem>>, vector<2x128xf32>,
    %c0_12 = arith.constant 0 : index
    %c128 = arith.constant 128 : index
    %33 = vector.load %arg3[%c0_12, %c128] : memref<2x512xf32, #tpu.memory_space<vmem>>, vector<2x256xf32>
    tpu.vector_store %arg3[%c0_12, %c128], %8 {strides = array<i32>} : memref<2x512xf32, #tpu.memory_space<vmem>>, vector<2x256xf32>,
    %c0_13 = arith.constant 0 : index
    %c127 = arith.constant 127 : index
    %34 = vector.load %arg3[%c0_13, %c127] : memref<2x512xf32, #tpu.memory_space<vmem>>, vector<2x256xf32>
    %cst_14 = arith.constant 0.000000e+00 : f32
    %35 = vector.shape_cast %27 : vector<1x256xi1> to vector<1x256xi1>
    %36 = vector.broadcast %35 : vector<1x256xi1> to vector<2x256xi1>
    %37 = vector.broadcast %cst_14 : f32 to vector<2x256xf32>
    %38 = arith.select %36, %34, %37 : vector<2x256xi1>, vector<2x256xf32>
    %c0_15 = arith.constant 0 : index
    %c129 = arith.constant 129 : index
    %39 = vector.load %arg3[%c0_15, %c129] : memref<2x512xf32, #tpu.memory_space<vmem>>, vector<2x256xf32>
    %cst_16 = arith.constant 0.000000e+00 : f32
    %40 = vector.shape_cast %29 : vector<1x256xi1> to vector<1x256xi1>
    %41 = vector.broadcast %40 : vector<1x256xi1> to vector<2x256xi1>
    %42 = vector.broadcast %cst_16 : f32 to vector<2x256xf32>
    %43 = arith.select %41, %39, %42 : vector<2x256xi1>, vector<2x256xf32>
    %cst_17 = arith.constant 2.000000e+00 : f32
    %44 = vector.broadcast %cst_17 : f32 to vector<2x256xf32>
    %45 = arith.mulf %44, %8 : vector<2x256xf32>
    %46 = arith.addf %38, %45 : vector<2x256xf32>
    %47 = arith.addf %46, %43 : vector<2x256xf32>
    %48 = arith.subf %43, %38 : vector<2x256xf32>
    %cst_18 = arith.constant 0.000000e+00 : f32
    %49 = vector.broadcast %cst_18 : f32 to vector<2x128xf32>
    %c0_19 = arith.constant 0 : index
    %c0_20 = arith.constant 0 : index
    %50 = vector.load %arg4[%c0_19, %c0_20] : memref<2x512xf32, #tpu.memory_space<vmem>>, vector<2x128xf32>
    tpu.vector_store %arg4[%c0_19, %c0_20], %49 {strides = array<i32>} : memref<2x512xf32, #tpu.memory_space<vmem>>, vector<2x128xf32>,
    %c0_21 = arith.constant 0 : index
    %c384_22 = arith.constant 384 : index
    %51 = vector.load %arg4[%c0_21, %c384_22] : memref<2x512xf32, #tpu.memory_space<vmem>>, vector<2x128xf32>
    tpu.vector_store %arg4[%c0_21, %c384_22], %49 {strides = array<i32>} : memref<2x512xf32, #tpu.memory_space<vmem>>, vector<2x128xf32>,
    %c0_23 = arith.constant 0 : index
    %c128_24 = arith.constant 128 : index
    %52 = vector.load %arg4[%c0_23, %c128_24] : memref<2x512xf32, #tpu.memory_space<vmem>>, vector<2x256xf32>
    tpu.vector_store %arg4[%c0_23, %c128_24], %47 {strides = array<i32>} : memref<2x512xf32, #tpu.memory_space<vmem>>, vector<2x256xf32>,
    %cst_25 = arith.constant 0.000000e+00 : f32
    %53 = vector.broadcast %cst_25 : f32 to vector<2x128xf32>
    %c0_26 = arith.constant 0 : index
    %c0_27 = arith.constant 0 : index
    %54 = vector.load %arg5[%c0_26, %c0_27] : memref<2x512xf32, #tpu.memory_space<vmem>>, vector<2x128xf32>
    tpu.vector_store %arg5[%c0_26, %c0_27], %53 {strides = array<i32>} : memref<2x512xf32, #tpu.memory_space<vmem>>, vector<2x128xf32>,
    %c0_28 = arith.constant 0 : index
    %c384_29 = arith.constant 384 : index
    %55 = vector.load %arg5[%c0_28, %c384_29] : memref<2x512xf32, #tpu.memory_space<vmem>>, vector<2x128xf32>
    tpu.vector_store %arg5[%c0_28, %c384_29], %53 {strides = array<i32>} : memref<2x512xf32, #tpu.memory_space<vmem>>, vector<2x128xf32>,
    %c0_30 = arith.constant 0 : index
    %c128_31 = arith.constant 128 : index
    %56 = vector.load %arg5[%c0_30, %c128_31] : memref<2x512xf32, #tpu.memory_space<vmem>>, vector<2x256xf32>
    tpu.vector_store %arg5[%c0_30, %c128_31], %48 {strides = array<i32>} : memref<2x512xf32, #tpu.memory_space<vmem>>, vector<2x256xf32>,
    %c0_32 = arith.constant 0 : index
    %c112 = arith.constant 112 : index
    %57 = vector.load %arg5[%c0_32, %c112] : memref<2x512xf32, #tpu.memory_space<vmem>>, vector<2x256xf32>
    %cst_33 = arith.constant 2.000000e+00 : f32
    %58 = vector.broadcast %cst_33 : f32 to vector<2x256xf32>
    %59 = arith.mulf %58, %48 : vector<2x256xf32>
    %60 = arith.addf %57, %59 : vector<2x256xf32>
    %c0_34 = arith.constant 0 : index
    %c144 = arith.constant 144 : index
    %61 = vector.load %arg5[%c0_34, %c144] : memref<2x512xf32, #tpu.memory_space<vmem>>, vector<2x256xf32>
    %62 = arith.addf %60, %61 : vector<2x256xf32>
    %c0_35 = arith.constant 0 : index
    %c144_36 = arith.constant 144 : index
    %63 = vector.load %arg4[%c0_35, %c144_36] : memref<2x512xf32, #tpu.memory_space<vmem>>, vector<2x256xf32>
    %c0_37 = arith.constant 0 : index
    %c112_38 = arith.constant 112 : index
    %64 = vector.load %arg4[%c0_37, %c112_38] : memref<2x512xf32, #tpu.memory_space<vmem>>, vector<2x256xf32>
    %65 = arith.subf %63, %64 : vector<2x256xf32>
    %66 = arith.mulf %62, %62 : vector<2x256xf32>
    %67 = arith.mulf %65, %65 : vector<2x256xf32>
    %68 = arith.addf %66, %67 : vector<2x256xf32>
    %69 = math.sqrt %68 : vector<2x256xf32>
    %c0_39 = arith.constant 0 : index
    %c0_40 = arith.constant 0 : index
    %70 = vector.load %arg2[%c0_39, %c0_40] : memref<2x256xf32, #tpu.memory_space<vmem>>, vector<2x256xf32>
    tpu.vector_store %arg2[%c0_39, %c0_40], %69 {strides = array<i32>} : memref<2x256xf32, #tpu.memory_space<vmem>>, vector<2x256xf32>,
    return
  }
  func.func @transform_0(%arg0: i32) -> (i32, i32) {
    %c0_i32 = arith.constant 0 : i32
    %c0_i32_0 = arith.constant 0 : i32
    return %arg0, %c0_i32 : i32, i32
  }
  func.func @transform_1(%arg0: i32) -> (i32, i32) {
    %c0_i32 = arith.constant 0 : i32
    %c0_i32_0 = arith.constant 0 : i32
    return %arg0, %c0_i32 : i32, i32
  }
}

</mosaic_0001>

<bundles_post_ra>
// kernel: tpu_custom_call.1
= control target key start
LH: loop header
LB: loop body
LE: loop exit
PB: predicated region body
PF: predicated region fallthrough
CT: control target
= control target key end

     0   :  { %6 = vsyncpa [#allocation6], 0  ;;  %s365_s0 = inlined_call_operand.hbm [shape: f32[2,1024], index: 0, kind: input, shape index: {}]   ;;  %s366_s1 = inlined_call_operand.hbm [shape: f32[2,256], index: 1, kind: output, shape index: {}]  }
   0x1   :  { %7 = vsyncpa [#allocation7], 0  ;;  %s321_s6 = smov [#allocation5]   ;;  %s273_s10 = scalar_lea.hbm %s365_s0, 256 }
   0x2   :  { %s14_s7 = sshll.u32 %s321_s6, 4  ;;  %p274_p0 = scmp.ne.s32.totalorder %s365_s0, %s273_s10  ;;  %s15_s7 = int_to_ptr.vmem [resolvable:$true] %s14_s7 }
   0x3   :  { %p277_p1 = scmp.lt.u32.totalorder %s273_s10, %s365_s0 }
   0x5   :  { %p279_p2 = pnand %p277_p1, %p274_p0 }
   0x7   :  { %282 = shalt.err (!%p279_p2)
}
   0x8   :  { %s283_s15 = scalar_lea.vmem %s15_s7, 256  ;;  %p288_p4 = scmp.lt.s32.totalorder %s15_s7, %s15_s7 }
   0x9   :  { %p284_p3 = scmp.ne.s32.totalorder %s15_s7, %s283_s15  ;;  %p289_p5 = scmp.lt.s32.totalorder %s283_s15, %s283_s15 }
   0xb   :  { %p290_p6 = por %p289_p5, %p288_p4 }
   0xd   :  { %p291_p7 = pnand %p290_p6, %p284_p3 }
   0xf   :  { %294 = shalt.err (!%p291_p7)
}
  0x10   :  { %17 = dma.hbm_to_vmem [thread:$0]  %s365_s0, 256, %s15_s7, [#allocation6]  }
  0x11   :  { %317 = dma.done.wait [#allocation6], 256  }
  0x12   :  { %318 = vsyncadd [#allocation6], 4294967040  ;;  %v322_v0 = vmov 0.0   ;;  %v21_v1 = vld [vmem:[#allocation5] sm:$0xf]  ;;  %v29_v8 = vlaneseq  ;;  %s324_s0 = smov 127  }
  0x13   :  { %61 = vst [vmem:[#allocation2 + $0x6] sm:$0x3] %v322_v0  ;;  %60 = vst [vmem:[#allocation2] sm:$0x3] %v322_v0  ;;  %v22_v2 = vld [vmem:[#allocation5 + $0x4] sm:$0xf] }
  0x14   :  { %151 = vst [vmem:[#allocation3] sm:$0x3] %v322_v0  ;;  %152 = vst [vmem:[#allocation3 + $0x6] sm:$0x3] %v322_v0  ;;  %v24_v3 = vld [vmem:[#allocation5 + $0x8] sm:$0xf]  ;;  %v23_v4 = vadd.f32 %v22_v2, %v21_v1 }
  0x15   :  { %165 = vst [vmem:[#allocation4] sm:$0x3] %v322_v0  ;;  %166 = vst [vmem:[#allocation4 + $0x6] sm:$0x3] %v322_v0  ;;  %v26_v5 = vld [vmem:[#allocation5 + $0xc] sm:$0xf] }
  0x16   :  { %v25_v6 = vadd.f32 %v24_v3, %v23_v4  ;;  %v323_v9 = vmov 1983009808   ;;  %v74_v13 = vshrl.u32 %v29_v8, 7  ;;  %s325_s18 = smov 1   ;;  %v30_v25 = vand.u32 127, %v29_v8  ;;  %s326_s19 = smov 112  }
  0x17   :  { %v71_v10 = vunpack.c.l.s4 %v323_v9  ;;  %vm91_vm0 = vcmask 7168   ;;  %vm126_vm3 = vcmask 1039360   ;;  %s327_s20 = smov 32   ;;  %s328_s21 = smov 96   ;;  %vm214_vm6 = vcmask 261120  }
  0x18   :  { %v27_v7 = vadd.f32 %v26_v5, %v25_v6  ;;  %v31_v27 = vadd.s32 128, %v30_v25  ;;  %v36_v28 = vand.u32 15, %v30_v25  ;;  %vm195_vm7 = vcmask 916480   ;;  %s329_s22 = smov 16   ;;  %s330_s23 = smov [#allocation8]  }
  0x19   :  { %v72_v12 = vunpack.c.0.s8 %v71_v10  ;;  %vm204_vm8 = vcmask 785408   ;;  %s248_s24 = sshll.u32 %s330_s23, 4  ;;  %vm238_vm11 = vcmask 130048   ;;  %s249_s24 = int_to_ptr.vmem [resolvable:$true] %s248_s24 }
  0x1a   :  { %v28_v11 = vmul.f32 0.25, %v27_v7  ;;  %v43_v30 = vand.u32 15, %v31_v27  ;;  %vm56_vm1 = vcmp.ne.s32.totalorder %v36_v28, 0  ;;  %vm58_vm4 = vcmp.ne.s32.totalorder %v36_v28, 15  ;;  %s295_s25 = scalar_lea.vmem %s249_s24, 64  ;;  %p300_p9 = scmp.lt.s32.totalorder %s249_s24, %s249_s24 }
  0x1b   :  { %v75_v14 = vsub.s32 %v72_v12, %v74_v13  ;;  %p296_p8 = scmp.ne.s32.totalorder %s249_s24, %s295_s25  ;;  %p301_p10 = scmp.lt.s32.totalorder %s295_s25, %s295_s25 }
  0x1c   :  { %62 = vst [vmem:[#allocation2 + $0x2] sm:$0xf] %v28_v11  ;;  %v133_v26 = vmul.f32 2.0, %v28_v11  ;;  %vm57_vm2 = vcmp.ne.s32.totalorder %v43_v30, 0  ;;  %vm59_vm5 = vcmp.ne.s32.totalorder %v43_v30, 15 }
  0x1d   :  { %p302_p11 = por %p301_p10, %p300_p9 }
  0x1e   :  { %v141_v29 = vrot.slane %v133_v26, %v75_v14 }
  0x1f   :  { %p303_p12 = pnand %p302_p11, %p296_p8 }
  0x20   :  { %v142_v33 = vcombine.high %v141_v29, %v141_v29 }
  0x23   :  { %v98_v15 = vld [vmem:[#allocation2 + $0x2] sm:$0x3f] }
  0x24   :  { %v63_v16 = vld [vmem:[#allocation2] sm:$0x3f]  ;;  %v111_v17 = vrot.slane %v98_v15, %v75_v14  ;;  %v104_v20 = vcombine.high %v98_v15, %v98_v15 }
  0x25   :  { %v76_v18 = vrot.slane %v63_v16, %v75_v14  ;;  %v69_v19 = vcombine.high %v63_v16, %v63_v16 }
  0x26   :  { %120 = vrot.lane.b32.xlu1 %v111_v17, %s324_s0  ;;  %v119_v23 = vcombine.high %v111_v17, %v111_v17  ;;  %v118_v24 = vrot.slane %v104_v20, %v75_v14 }
  0x27   :  { %85 = vrot.lane.b32.xlu0 %v76_v18, %s325_s18  ;;  %v84_v21 = vcombine.high %v76_v18, %v76_v18  ;;  %v83_v22 = vrot.slane %v69_v19, %v75_v14 }
  0x2a   :  { %89 = vrot.lane.b32.xlu1 %v83_v22, %s325_s18 }
  0x2b   :  { %87 = vrot.lane.b32.xlu0 %v84_v21, %s325_s18 }
  0x2e   :  { %124 = vrot.lane.b32.xlu1 %v118_v24, %s324_s0 }
  0x2f   :  { %122 = vrot.lane.b32.xlu0 %v119_v23, %s324_s0 }
  0x98   :  { %v121_v31 = vpop.permute.xlu1 %120 }
  0x99   :  { %v86_v32 = vpop.permute.xlu0 %85 }
  0x9c   :  { %v90_v35 = vpop.permute.xlu1 %89 }
  0x9d   :  { %v88_v34 = vpop.permute.xlu0 %87 }
  0x9e   :  { %v92_v36 = vsel %vm91_vm0, %v86_v32, %v88_v34  ;;  %v93_v37 = vsel %vm91_vm0, %v88_v34, %v90_v35 }
  0x9f   :  { %v96_v38 = vsel %vm56_vm1, %v92_v36, 0.0  ;;  %v97_v39 = vsel %vm57_vm2, %v93_v37, 0.0 }
  0xa0   :  { %v145_v40 = vadd.f32 %v141_v29, %v96_v38  ;;  %v146_v41 = vadd.f32 %v142_v33, %v97_v39  ;;  %v125_v43 = vpop.permute.xlu1 %124 }
  0xa1   :  { %v123_v42 = vpop.permute.xlu0 %122 }
  0xa2   :  { %v127_v44 = vsel %vm126_vm3, %v121_v31, %v123_v42  ;;  %v128_v45 = vsel %vm126_vm3, %v123_v42, %v125_v43 }
  0xa3   :  { %v131_v46 = vsel %vm58_vm4, %v127_v44, 0.0  ;;  %v132_v47 = vsel %vm59_vm5, %v128_v45, 0.0 }
  0xa4   :  { %v147_v48 = vadd.f32 %v145_v40, %v131_v46  ;;  %v149_v49 = vsub.f32 %v131_v46, %v96_v38  ;;  %v148_v50 = vadd.f32 %v146_v41, %v132_v47  ;;  %v150_v51 = vsub.f32 %v132_v47, %v97_v39 }
  0xa6   :  { %v180_v52 = vmul.f32 2.0, %v149_v49  ;;  %v155_v53 = vcombine.low %v147_v48, %v148_v50  ;;  %v169_v54 = vcombine.low %v149_v49, %v150_v51  ;;  %v181_v55 = vmul.f32 2.0, %v150_v51 }
  0xa8   :  { %257 = vst.sshfl [vmem:[#allocation3 + $0x2] sm:$0x33 pattern:$0x76325410] %v155_v53  ;;  %v184_v56 = vcombine.low %v180_v52, %v181_v55 }
  0xa9   :  { %258 = vst.sshfl [vmem:[#allocation4 + $0x2] sm:$0x33 pattern:$0x76325410] %v169_v54 }
  0xaa   :  { %v191_v57 = vrot.slane %v184_v56, %v75_v14 }
  0xac   :  { %192 = vrot.lane.b32.xlu1 %v191_v57, %s326_s19 }
  0xaf   :  { %v209_v58 = vld [vmem:[#allocation3] sm:$0x3f] }
  0xb0   :  { %211 = vrot.lane.b32.xlu0 %v209_v58, %s327_s20  ;;  %v199_v59 = vld [vmem:[#allocation4 + $0x2] sm:$0x3f]  ;;  %v208_v62 = vld [vmem:[#allocation3 + $0x2] sm:$0x3f] }
  0xb1   :  { %v179_v7 = vld [vmem:[#allocation4] sm:$0x3f] }
  0xb4   :  { %201 = vrot.lane.b32.xlu0 %v199_v59, %s328_s21 }
 0x11e   :  { %v193_v2 = vpop.permute.xlu1 %192 }
 0x11f   :  { %v194_v4 = vrot.slane %v193_v2, 6 }
 0x121   :  { %v196_v6 = vsel %vm195_vm7, %v194_v4, %v193_v2 }
 0x122   :  { %v212_v60 = vpop.permute.xlu0 %211  ;;  %v198_v9 = vadd.f32 %v196_v6, %v179_v7 }
 0x123   :  { %v213_v61 = vrot.slane %v212_v60, 2 }
 0x125   :  { %v215_v63 = vsel %vm214_vm6, %v212_v60, %v213_v61 }
 0x126   :  { %v217_v0 = vsub.f32 %v208_v62, %v215_v63  ;;  %v202_v3 = vpop.permute.xlu0 %201 }
 0x127   :  { %v203_v5 = vrot.slane %v202_v3, 6 }
 0x128   :  { %v219_v1 = vmul.f32 %v217_v0, %v217_v0 }
 0x129   :  { %v205_v8 = vsel %vm204_vm8, %v203_v5, %v202_v3 }
 0x12a   :  { %221 = vrot.lane.b32.xlu1 %v219_v1, %s328_s21  ;;  %v207_v10 = vadd.f32 %v205_v8, %v198_v9 }
 0x12c   :  { %v218_v13 = vmul.f32 %v207_v10, %v207_v10 }
 0x19c   :  { %v222_v11 = vpop.permute.xlu1 %221 }
 0x19d   :  { %v223_v12 = vrot.slane %v222_v11, 6 }
 0x19f   :  { %v224_v14 = vsel %vm204_vm8, %v223_v12, %v222_v11 }
 0x1a0   :  { %v226_v15 = vadd.f32 %v224_v14, %v218_v13 }
 0x1a2   :  { %271 = vrsqrt.f32 %v226_v15  ;;  %vm229_vm9 = vcmp.eq.f32.partialorder %v226_v15, inf  ;;  %v232_v18 = vand.u32 2147483648, %v226_v15  ;;  %vm231_vm10 = vcmp.eq.f32.partialorder %v226_v15, 0.0 }
 0x1ac   :  { %v272_v16 = vpop.eup %271 }
 0x1ad   :  { %v228_v17 = vmul.f32 %v272_v16, %v226_v15 }
 0x1af   :  { %v230_v19 = vsel %vm229_vm9, %v226_v15, %v228_v17 }
 0x1b0   :  { %v233_v20 = vsel %vm231_vm10, %v232_v18, %v230_v19 }
 0x1b1   :  { %235 = vrot.lane.b32.xlu0 %v233_v20, %s329_s22 }
 0x223   :  { %v236_v21 = vpop.permute.xlu0 %235 }
 0x224   :  { %v237_v22 = vrot.slane %v236_v21, 2 }
 0x226   :  { %v239_v23 = vsel %vm238_vm11, %v236_v21, %v237_v22 }
 0x227   :  { %241 = vst [vmem:[#allocation8] sm:$0xf] %v239_v23 }
 0x228   :  { %306 = shalt.err (!%p303_p12)
}
 0x229   :  { %s307_s28 = scalar_lea.hbm %s366_s1, 64 }
 0x22a   :  { %p308_p13 = scmp.ne.s32.totalorder %s366_s1, %s307_s28  ;;  %p311_p0 = scmp.lt.u32.totalorder %s307_s28, %s366_s1 }
 0x22c   :  { %p313_p1 = pnand %p311_p0, %p308_p13 }
 0x22e   :  { %316 = shalt.err (!%p313_p1)
}
 0x22f   :  { %251 = dma.vmem_to_hbm [thread:$0]  %s249_s24, 64, %s366_s1, [#allocation7]  }
 0x230   :  { %319 = dma.done.wait [#allocation7], 64  }
 0x231   :  { %320 = vsyncadd [#allocation7], 4294967232 }
 0x232   :  { %255 = vsyncpa [#allocation6], 1 }
 0x233   :  { %256 = vsyncpa [#allocation7], 1 }

</bundles_post_ra>
